<compile_context>
chip_gen: v5e
topology: v5e:2x2
jax: 0.10.0
libtpu: 0.0.40
codegen_flags: <defaults>
</compile_context>

<pallas_src>
import jax
import jax.numpy as jnp
from jax.experimental import pallas as pl
from jax.experimental.pallas import tpu as pltpu

_LANES = 128


def _cdiv(a, b):
    return -(-a // b)


def _choose_block_rows(total_rows, k):
    # HBM-bandwidth-bound elementwise kernel: make tiles as large as VMEM comfortably
    # allows.  Double-buffered input footprint per grid step is
    #   2 * (2 + K) * block_rows * 128 * 4 bytes
    # Target ~10 MiB for that (block_rows ~ 2048 at K=3), leaving the rest of the
    # explicit 32 MiB scoped-VMEM budget for elementwise temporaries — safe on
    # v5e/v6e (128 MiB physical) and v7x (64 MiB physical).
    target_dbuf_bytes = 10 * 1024 * 1024
    per_row_bytes = 2 * (2 + k) * _LANES * 4
    br = target_dbuf_bytes // per_row_bytes
    br = max(8, min(2048, (br // 8) * 8))
    # Don't tile bigger than the (sublane-rounded) problem itself.
    rows_rounded = ((total_rows + 7) // 8) * 8
    return min(br, rows_rounded)


def _bce_decorr_kernel(c_ref, n_ref, x_ref, y_ref, odds_ref, partial_ref):
    i = pl.program_id(0)
    nb = pl.num_programs(0)

    c = c_ref[0]                                  # runtime scalar (SMEM)
    n_valid = n_ref[0]                            # runtime scalar (SMEM)

    x = x_ref[...].astype(jnp.float32)            # [BR, 128] predicted probabilities
    y = y_ref[...].astype(jnp.float32)            # [BR, 128] targets
    odds = odds_ref[...].astype(jnp.float32)      # [K, BR, 128] bookmaker odds (transposed)

    # PyTorch BCELoss clamps log terms at -100.
    log_x = jnp.maximum(jnp.log(x), -100.0)
    log_1mx = jnp.maximum(jnp.log(1.0 - x), -100.0)

    # booker_p = L1-normalized 1/odds, column 0.  Reduction over the leading K axis
    # is a cheap K-term elementwise add (no cross-lane work).
    inv = 1.0 / odds
    l1 = jnp.sum(jnp.abs(inv), axis=0)            # [BR, 128]
    booker_p = inv[0] / jnp.maximum(l1, 1e-12)    # [BR, 128]

    # Fused: result_d - c*booker_d = -(a*log_x + b*log_1mx)
    a = y - c * booker_p
    b = (1.0 - c) - a
    term = -(a * log_x + b * log_1mx)             # [BR, 128]

    br, lanes = term.shape

    def partial_sum(t):
        # Leading-axis (VPU-only) reduction to an (8, 128) vreg-shaped partial;
        # the single cross-lane/sublane reduce to a scalar happens in JAX afterwards.
        return jnp.sum(t.reshape(br // 8, 8, lanes), axis=0)

    @pl.when(i < nb - 1)
    def _():
        # Interior blocks contain no padding -> no mask work, no int32 iota temps.
        partial_ref[...] = partial_sum(term)

    @pl.when(i == nb - 1)
    def _():
        # Only the last block can contain padded elements; mask them out here.
        row = jax.lax.broadcasted_iota(jnp.int32, (br, lanes), 0)
        lane = jax.lax.broadcasted_iota(jnp.int32, (br, lanes), 1)
        gidx = (i * br + row) * lanes + lane
        partial_ref[...] = partial_sum(jnp.where(gidx < n_valid, term, 0.0))


def bce_decorrelation_loss(output, y, odds, c, *, block_rows=None):
    """output: [N, 1], y: [N, 1], odds: [N, K], c: scalar.  Returns f32 scalar loss."""
    n = output.shape[0]
    k = odds.shape[1]
    assert y.shape[0] == n and odds.shape[0] == n

    rows = _cdiv(n, _LANES)
    if block_rows is None:
        block_rows = _choose_block_rows(rows, k)
    assert block_rows % 8 == 0
    rows_pad = _cdiv(rows, block_rows) * block_rows
    n_pad = rows_pad * _LANES
    num_blocks = rows_pad // block_rows
    pad = n_pad - n

    # Lane-dense slabs: batch index -> (row = idx // 128, lane = idx % 128).
    # Padding values are "safe" (finite terms) and masked out in-kernel anyway.
    # Slabs stay in the caller's dtype (bf16 halves HBM traffic); f32 cast is in-kernel.
    # TODO(synk): for repeated calls, accept pre-laid-out [rows,128] / [K,rows,128]
    # slabs (or fuse this pad/transpose into the upstream producer under one jit)
    # to avoid the extra wrapper-side HBM passes.
    x_slab = jnp.pad(output.reshape(-1), (0, pad),
                     constant_values=0.5).reshape(rows_pad, _LANES)
    y_slab = jnp.pad(y.reshape(-1), (0, pad),
                     constant_values=0.0).reshape(rows_pad, _LANES)
    odds_slab = jnp.pad(odds.T, ((0, 0), (0, pad)),
                        constant_values=1.0).reshape(k, rows_pad, _LANES)

    c_arr = jnp.full((1,), c, dtype=jnp.float32)
    n_arr = jnp.full((1,), n, dtype=jnp.int32)

    partials = pl.pallas_call(
        _bce_decorr_kernel,
        out_shape=jax.ShapeDtypeStruct((num_blocks, 8, _LANES), jnp.float32),
        grid_spec=pltpu.PrefetchScalarGridSpec(
            num_scalar_prefetch=0,
            grid=(num_blocks,),
            in_specs=[
                pl.BlockSpec(memory_space=pltpu.MemorySpace.SMEM),            # c (runtime scalar)
                pl.BlockSpec(memory_space=pltpu.MemorySpace.SMEM),            # n (runtime scalar)
                pl.BlockSpec((block_rows, _LANES), lambda i: (i, 0)),         # x slab
                pl.BlockSpec((block_rows, _LANES), lambda i: (i, 0)),         # y slab
                pl.BlockSpec((k, block_rows, _LANES), lambda i: (0, i, 0)),   # odds^T slab
            ],
            # One (8,128) partial-sum block per grid step -> no carried state,
            # grid axis is safely "parallel" (both v7x TensorCores).
            out_specs=pl.BlockSpec((None, 8, _LANES), lambda i: (i, 0, 0)),
        ),
        compiler_params=pltpu.CompilerParams(
            dimension_semantics=("parallel",),
            vmem_limit_bytes=32 * 1024 * 1024,
        ),
    )(c_arr, n_arr, x_slab, y_slab, odds_slab)

    # Tiny final reduction + mean (num_blocks * 1024 f32 values).
    return jnp.sum(partials) / jnp.float32(n)


def _reference(output, y, odds, c):
    x = output.astype(jnp.float32)
    yy = y.astype(jnp.float32)
    log_x = jnp.maximum(jnp.log(x), -100.0)
    log_1mx = jnp.maximum(jnp.log(1.0 - x), -100.0)
    result_d = -(yy * log_x + (1.0 - yy) * log_1mx)
    inv = 1.0 / odds.astype(jnp.float32)
    booker_p = (inv / jnp.maximum(jnp.sum(jnp.abs(inv), axis=1, keepdims=True), 1e-12))[:, 0:1]
    booker_d = -(booker_p * log_x + (1.0 - booker_p) * log_1mx)
    return jnp.mean(result_d - c * booker_d)


if __name__ == "__main__":
    key = jax.random.PRNGKey(0)
    k1, k2, k3 = jax.random.split(key, 3)

    # Small shapes consistent with the module: batch of 8 samples, 3 bookmaker outcomes.
    N, K = 8, 3
    c = 0.5

    output = jax.nn.sigmoid(jax.random.normal(k1, (N, 1), dtype=jnp.float32))     # probs in (0,1)
    y = (jax.random.uniform(k2, (N, 1)) > 0.5).astype(jnp.float32)                # binary targets
    odds = 1.5 + 3.5 * jax.random.uniform(k3, (N, K), dtype=jnp.float32)          # odds in [1.5, 5.0)

    loss = jax.block_until_ready(bce_decorrelation_loss(output, y, odds, c))
    ref = jax.block_until_ready(_reference(output, y, odds, c))
    assert jnp.allclose(loss, ref, atol=1e-5, rtol=1e-5), (loss, ref)

    # Second check: multi-block grid (forces the non-last / last branches and the
    # parallel per-block partial-sum path) plus intra-block padding masking.
    k4, k5, k6 = jax.random.split(jax.random.PRNGKey(1), 3)
    N2, K2 = 2000, 4
    output2 = jax.nn.sigmoid(jax.random.normal(k4, (N2, 1), dtype=jnp.float32))
    y2 = (jax.random.uniform(k5, (N2, 1)) > 0.5).astype(jnp.float32)
    odds2 = 1.5 + 3.5 * jax.random.uniform(k6, (N2, K2), dtype=jnp.float32)
    loss2 = jax.block_until_ready(bce_decorrelation_loss(output2, y2, odds2, 0.3, block_rows=8))
    ref2 = jax.block_until_ready(_reference(output2, y2, odds2, 0.3))
    assert jnp.allclose(loss2, ref2, atol=1e-5, rtol=1e-5), (loss2, ref2)

    print("KERNEL_OK")
</pallas_src>

<mosaic_0001>
module attributes {stable_mosaic.version = 11 : i64} {
  func.func @_bce_decorr_kernel(%arg0: i32, %arg1: memref<1xf32, #tpu.memory_space<smem>>, %arg2: memref<1xi32, #tpu.memory_space<smem>>, %arg3: memref<8x128xf32, #tpu.memory_space<vmem>>, %arg4: memref<8x128xf32, #tpu.memory_space<vmem>>, %arg5: memref<3x8x128xf32, #tpu.memory_space<vmem>>, %arg6: memref<1x8x128xf32, #tpu.memory_space<vmem>>) attributes {dimension_semantics = [#tpu.dimension_semantics<parallel>], iteration_bounds = array<i64: 1>, scalar_prefetch = 0 : i64, scratch_operands = 0 : i64, tpu.core_type = #tpu.core_type<tc>, window_params = [{transform_indices = @transform_0, window_bounds = array<i64: 1>}, {transform_indices = @transform_1, window_bounds = array<i64: 1>}, {transform_indices = @transform_2, window_bounds = array<i64: 8, 128>}, {transform_indices = @transform_3, window_bounds = array<i64: 8, 128>}, {transform_indices = @transform_4, window_bounds = array<i64: 3, 8, 128>}, {transform_indices = @transform_5, window_bounds = array<i64: 1, 8, 128>}]} {
    %c0 = arith.constant 0 : index
    %0 = memref.load %arg1[%c0] : memref<1xf32, #tpu.memory_space<smem>>
    %c0_0 = arith.constant 0 : index
    %1 = memref.load %arg2[%c0_0] : memref<1xi32, #tpu.memory_space<smem>>
    %c0_1 = arith.constant 0 : index
    %c0_2 = arith.constant 0 : index
    %2 = vector.load %arg3[%c0_1, %c0_2] : memref<8x128xf32, #tpu.memory_space<vmem>>, vector<8x128xf32>
    %c0_3 = arith.constant 0 : index
    %c0_4 = arith.constant 0 : index
    %3 = vector.load %arg4[%c0_3, %c0_4] : memref<8x128xf32, #tpu.memory_space<vmem>>, vector<8x128xf32>
    %c0_5 = arith.constant 0 : index
    %c0_6 = arith.constant 0 : index
    %c0_7 = arith.constant 0 : index
    %4 = vector.load %arg5[%c0_5, %c0_6, %c0_7] : memref<3x8x128xf32, #tpu.memory_space<vmem>>, vector<3x8x128xf32>
    %5 = math.log %2 : vector<8x128xf32>
    %cst = arith.constant -1.000000e+02 : f32
    %6 = vector.broadcast %cst : f32 to vector<8x128xf32>
    %7 = arith.maximumf %5, %6 : vector<8x128xf32>
    %cst_8 = arith.constant 1.000000e+00 : f32
    %8 = vector.broadcast %cst_8 : f32 to vector<8x128xf32>
    %9 = arith.subf %8, %2 : vector<8x128xf32>
    %10 = math.log %9 : vector<8x128xf32>
    %cst_9 = arith.constant -1.000000e+02 : f32
    %11 = vector.broadcast %cst_9 : f32 to vector<8x128xf32>
    %12 = arith.maximumf %10, %11 : vector<8x128xf32>
    %cst_10 = arith.constant 1.000000e+00 : f32
    %13 = vector.broadcast %cst_10 : f32 to vector<3x8x128xf32>
    %14 = arith.divf %13, %4 : vector<3x8x128xf32>
    %15 = math.absf %14 : vector<3x8x128xf32>
    %cst_11 = arith.constant dense<0.000000e+00> : vector<8x128xf32>
    %16 = vector.multi_reduction <add>, %15, %cst_11 [0] : vector<3x8x128xf32> to vector<8x128xf32>
    %17 = vector.extract_strided_slice %14 {offsets = [0, 0, 0], sizes = [1, 8, 128], strides = [1, 1, 1]} : vector<3x8x128xf32> to vector<1x8x128xf32>
    %18 = vector.shape_cast %17 : vector<1x8x128xf32> to vector<8x128xf32>
    %cst_12 = arith.constant 9.99999996E-13 : f32
    %19 = vector.broadcast %cst_12 : f32 to vector<8x128xf32>
    %20 = arith.maximumf %16, %19 : vector<8x128xf32>
    %21 = arith.divf %18, %20 : vector<8x128xf32>
    %22 = vector.broadcast %0 : f32 to vector<8x128xf32>
    %23 = arith.mulf %22, %21 : vector<8x128xf32>
    %24 = arith.subf %3, %23 : vector<8x128xf32>
    %cst_13 = arith.constant 1.000000e+00 : f32
    %25 = arith.subf %cst_13, %0 : f32
    %26 = vector.broadcast %25 : f32 to vector<8x128xf32>
    %27 = arith.subf %26, %24 : vector<8x128xf32>
    %28 = arith.mulf %24, %7 : vector<8x128xf32>
    %29 = arith.mulf %27, %12 : vector<8x128xf32>
    %30 = arith.addf %28, %29 : vector<8x128xf32>
    %cst_14 = arith.constant 0.000000e+00 : f32
    %31 = vector.broadcast %cst_14 : f32 to vector<8x128xf32>
    %32 = arith.subf %31, %30 : vector<8x128xf32>
    %c0_i32 = arith.constant 0 : i32
    %33 = arith.cmpi slt, %arg0, %c0_i32 : i32
    %34 = arith.extui %33 : i1 to i32
    %c0_i32_15 = arith.constant 0 : i32
    %35 = arith.cmpi ne, %34, %c0_i32_15 : i32
    scf.if %35 {
      %39 = vector.shape_cast %32 : vector<8x128xf32> to vector<1x8x128xf32>
      %cst_18 = arith.constant dense<0.000000e+00> : vector<8x128xf32>
      %40 = vector.multi_reduction <add>, %39, %cst_18 [0] : vector<1x8x128xf32> to vector<8x128xf32>
      %c0_19 = arith.constant 0 : index
      %c0_20 = arith.constant 0 : index
      %c0_21 = arith.constant 0 : index
      %41 = vector.load %arg6[%c0_19, %c0_20, %c0_21] : memref<1x8x128xf32, #tpu.memory_space<vmem>>, vector<1x8x128xf32>
      %42 = vector.shape_cast %41 : vector<1x8x128xf32> to vector<8x128xf32>
      %43 = vector.shape_cast %40 : vector<8x128xf32> to vector<1x8x128xf32>
      tpu.vector_store %arg6[%c0_19, %c0_20, %c0_21], %43 {strides = array<i32>} : memref<1x8x128xf32, #tpu.memory_space<vmem>>, vector<1x8x128xf32>,
    } else {
    }
    %c0_i32_16 = arith.constant 0 : i32
    %36 = arith.cmpi eq, %arg0, %c0_i32_16 : i32
    %37 = arith.extui %36 : i1 to i32
    %c0_i32_17 = arith.constant 0 : i32
    %38 = arith.cmpi ne, %37, %c0_i32_17 : i32
    scf.if %38 {
      %39 = tpu.iota {dimensions = array<i32: 0>} : vector<8x128xi32>
      %40 = tpu.iota {dimensions = array<i32: 1>} : vector<8x128xi32>
      %c8_i32 = arith.constant 8 : i32
      %41 = arith.muli %arg0, %c8_i32 : i32
      %42 = vector.broadcast %41 : i32 to vector<8x128xi32>
      %43 = arith.addi %42, %39 : vector<8x128xi32>
      %c128_i32 = arith.constant 128 : i32
      %44 = vector.broadcast %c128_i32 : i32 to vector<8x128xi32>
      %45 = arith.muli %43, %44 : vector<8x128xi32>
      %46 = arith.addi %45, %40 : vector<8x128xi32>
      %47 = vector.broadcast %1 : i32 to vector<8x128xi32>
      %48 = arith.cmpi slt, %46, %47 : vector<8x128xi32>
      %cst_18 = arith.constant 0.000000e+00 : f32
      %49 = vector.broadcast %cst_18 : f32 to vector<8x128xf32>
      %50 = arith.select %48, %32, %49 : vector<8x128xi1>, vector<8x128xf32>
      %51 = vector.shape_cast %50 : vector<8x128xf32> to vector<1x8x128xf32>
      %cst_19 = arith.constant dense<0.000000e+00> : vector<8x128xf32>
      %52 = vector.multi_reduction <add>, %51, %cst_19 [0] : vector<1x8x128xf32> to vector<8x128xf32>
      %c0_20 = arith.constant 0 : index
      %c0_21 = arith.constant 0 : index
      %c0_22 = arith.constant 0 : index
      %53 = vector.load %arg6[%c0_20, %c0_21, %c0_22] : memref<1x8x128xf32, #tpu.memory_space<vmem>>, vector<1x8x128xf32>
      %54 = vector.shape_cast %53 : vector<1x8x128xf32> to vector<8x128xf32>
      %55 = vector.shape_cast %52 : vector<8x128xf32> to vector<1x8x128xf32>
      tpu.vector_store %arg6[%c0_20, %c0_21, %c0_22], %55 {strides = array<i32>} : memref<1x8x128xf32, #tpu.memory_space<vmem>>, vector<1x8x128xf32>,
    } else {
    }
    return
  }
  func.func @transform_0(%arg0: i32) -> i32 {
    %c0_i32 = arith.constant 0 : i32
    %c0_i32_0 = arith.constant 0 : i32
    return %c0_i32 : i32
  }
  func.func @transform_1(%arg0: i32) -> i32 {
    %c0_i32 = arith.constant 0 : i32
    %c0_i32_0 = arith.constant 0 : i32
    return %c0_i32 : i32
  }
  func.func @transform_2(%arg0: i32) -> (i32, i32) {
    %c0_i32 = arith.constant 0 : i32
    %c0_i32_0 = arith.constant 0 : i32
    return %arg0, %c0_i32 : i32, i32
  }
  func.func @transform_3(%arg0: i32) -> (i32, i32) {
    %c0_i32 = arith.constant 0 : i32
    %c0_i32_0 = arith.constant 0 : i32
    return %arg0, %c0_i32 : i32, i32
  }
  func.func @transform_4(%arg0: i32) -> (i32, i32, i32) {
    %c0_i32 = arith.constant 0 : i32
    %c0_i32_0 = arith.constant 0 : i32
    %c0_i32_1 = arith.constant 0 : i32
    return %c0_i32, %arg0, %c0_i32_0 : i32, i32, i32
  }
  func.func @transform_5(%arg0: i32) -> (i32, i32, i32) {
    %c0_i32 = arith.constant 0 : i32
    %c0_i32_0 = arith.constant 0 : i32
    %c0_i32_1 = arith.constant 0 : i32
    return %arg0, %c0_i32, %c0_i32_0 : i32, i32, i32
  }
}

</mosaic_0001>

<bundles_post_ra>
// kernel: tpu_custom_call.1
= control target key start
LH: loop header
LB: loop body
LE: loop exit
PB: predicated region body
PF: predicated region fallthrough
CT: control target
= control target key end

     0   :  { %12 = vsyncpa [#allocation5], 0  ;;  %s384_s0 = inlined_call_operand.<no memory space> [shape: f32[1], index: 0, kind: input, shape index: {}]   ;;  %s385_s1 = inlined_call_operand.<no memory space> [shape: s32[1], index: 1, kind: input, shape index: {}]   ;;  %s386_s2 = inlined_call_operand.hbm [shape: f32[8,128], index: 2, kind: input, shape index: {}]   ;;  %s387_s3 = inlined_call_operand.hbm [shape: f32[8,128], index: 3, kind: input, shape index: {}]   ;;  %s388_s4 = inlined_call_operand.hbm [shape: f32[3,8,128], index: 4, kind: input, shape index: {}]   ;;  %s389_s5 = inlined_call_operand.hbm [shape: f32[1,8,128], index: 5, kind: output, shape index: {}]  }
   0x1   :  { %13 = vsyncpa [#allocation8], 0  ;;  %s35_s20 = sshll.u32 %s387_s3, 4  ;;  %s36_s20 = int_to_ptr.hbm [resolvable:$true] %s35_s20 }
   0x2   :  { %14 = vsyncpa [#allocation6], 0  ;;  %s318_s21 = smov [#allocation7]   ;;  %s24_s25 = sshll.u32 %s386_s2, 4  ;;  %s25_s25 = int_to_ptr.hbm [resolvable:$true] %s24_s25 }
   0x3   :  { %s37_s22 = sshll.u32 %s318_s21, 4  ;;  %s319_s26 = smov [#allocation4]   ;;  %s38_s22 = int_to_ptr.vmem [resolvable:$true] %s37_s22 }
   0x4   :  { %40 = dma.hbm_to_vmem [thread:$0]  %s36_s20, 128, %s38_s22, [#allocation8]  }
   0x5   :  { %s26_s27 = sshll.u32 %s319_s26, 4  ;;  %s45_s30 = sshll.u32 %s388_s4, 4  ;;  %s27_s27 = int_to_ptr.vmem [resolvable:$true] %s26_s27  ;;  %s46_s30 = int_to_ptr.hbm [resolvable:$true] %s45_s30 }
   0x6   :  { %29 = dma.hbm_to_vmem [thread:$0]  %s25_s25, 128, %s27_s27, [#allocation5]  }
   0x7   :  { %s320_s3 = smov [#allocation9]   ;;  %s321_s7 = smov 128  }
   0x8   :  { %s47_s6 = sshll.u32 %s320_s3, 4  ;;  %s322_s8 = smov 8   ;;  %s48_s6 = int_to_ptr.vmem [resolvable:$true] %s47_s6 }
   0x9   :  { %53 = dma.hbm_to_vmem [thread:$0]  %s46_s30, 384, %s48_s6, [#allocation8], %s321_s7, %s321_s7, %s322_s8  }
   0xa   :  { %312 = dma.done.wait [#allocation5], 128  }
   0xb   :  { %313 = vsyncadd [#allocation5], 4294967168 }
   0xc   :  { %314 = dma.done.wait [#allocation8], 512  }
   0xd   :  { %315 = vsyncadd [#allocation8], 4294966784  ;;  %v70_v0 = vld [vmem:[#allocation9] sm:$0xff]  ;;  %v71_v1 = vld [vmem:[#allocation9 + $0x8] sm:$0xff]  ;;  %v166_v50 = vlaneseq  ;;  %v146_v56 = vstv %s384_s0  ;;  %s149_s11 = ssub.f32 1.0, %s384_s0  ;;  %s323_s0 = smov [#allocation10]  }
   0xe   :  { %v72_v2 = vld [vmem:[#allocation9 + $0x10] sm:$0xff]  ;;  %204 = vrcp.f32 %v70_v0  ;;  %vm85_vm0 = vweird.f32 %v70_v0  ;;  %v89_v6 = vand.u32 2147483647, %v70_v0  ;;  %v91_v7 = vand.u32 2147483648, %v70_v0  ;;  %v69_v60 = vld [vmem:[#allocation7] sm:$0xff]  ;;  %s185_s14 = sshll.u32 %s323_s0, 4  ;;  %s186_s14 = int_to_ptr.vmem [resolvable:$true] %s185_s14 }
   0xf   :  { %206 = vrcp.f32 %v71_v1  ;;  %vm100_vm2 = vweird.f32 %v71_v1  ;;  %v104_v11 = vand.u32 2147483647, %v71_v1  ;;  %v106_v12 = vand.u32 2147483648, %v71_v1  ;;  %v68_v40 = vld [vmem:[#allocation4] sm:$0xff]  ;;  %s187_s17 = sshll.u32 %s389_s5, 4  ;;  %s188_s17 = int_to_ptr.hbm [resolvable:$true] %s187_s17 }
  0x10   :  { %208 = vrcp.f32 %v72_v2  ;;  %vm115_vm3 = vweird.f32 %v72_v2  ;;  %v121_v16 = vand.u32 2147483648, %v72_v2  ;;  %v92_v18 = vor.u32 1.1754944e-38, %v91_v7 }
  0x11   :  { %v119_v20 = vand.u32 2147483647, %v72_v2  ;;  %vm90_vm7 = vcmp.eq.f32.partialorder %v89_v6, 8.507059e+37  ;;  %v107_v23 = vor.u32 1.1754944e-38, %v106_v12  ;;  %vm105_vm9 = vcmp.eq.f32.partialorder %v104_v11, 8.507059e+37 }
  0x12   :  { %v122_v27 = vor.u32 1.1754944e-38, %v121_v16  ;;  %v76_v41 = vsub.f32 1.0, %v68_v40  ;;  %v167_v57 = vshrl.u32 %v166_v50, 7  ;;  %v150_v63 = vstv %s149_s11 }
  0x13   :  { %vm120_vm11 = vcmp.eq.f32.partialorder %v119_v20, 8.507059e+37 }
  0x14   :  { %v205_v3 = vpop.eup %204 }
  0x15   :  { %v81_v4 = vmul.f32 %v205_v3, %v70_v0  ;;  %v207_v5 = vpop.eup %206  ;;  %vm86_vm1 = vweird.f32 %v205_v3  ;;  %v169_v0 = vand.u32 127, %v166_v50 }
  0x16   :  { %v209_v8 = vpop.eup %208  ;;  %v96_v10 = vmul.f32 %v207_v5, %v71_v1  ;;  %vm101_vm4 = vweird.f32 %v207_v5  ;;  %vm364_vm5 = vmor %vm85_vm0, %vm86_vm1  ;;  %v173_v1 = vmul.u32 128, %v167_v57 }
  0x17   :  { %v82_v9 = vsub.f32 1.0, %v81_v4  ;;  %v111_v13 = vmul.f32 %v209_v8, %v72_v2  ;;  %vm116_vm6 = vweird.f32 %v209_v8  ;;  %vm102_vm8 = vmor %vm100_vm2, %vm101_vm4 }
  0x18   :  { %v97_v15 = vsub.f32 1.0, %v96_v10  ;;  %vm117_vm10 = vmor %vm115_vm3, %vm116_vm6  ;;  %v174_v6 = vadd.s32 %v173_v1, %v169_v0 }
  0x19   :  { %v83_v14 = vmul.f32 %v205_v3, %v82_v9  ;;  %v112_v19 = vsub.f32 1.0, %v111_v13 }
  0x1a   :  { %v98_v22 = vmul.f32 %v207_v5, %v97_v15 }
  0x1b   :  { %v84_v21 = vadd.f32 %v205_v3, %v83_v14  ;;  %v113_v24 = vmul.f32 %v209_v8, %v112_v19 }
  0x1c   :  { %v99_v26 = vadd.f32 %v207_v5, %v98_v22 }
  0x1d   :  { %v88_v25 = vsel %vm364_vm5, %v205_v3, %v84_v21  ;;  %v114_v29 = vadd.f32 %v209_v8, %v113_v24 }
  0x1e   :  { %v93_v28 = vsel %vm90_vm7, %v92_v18, %v88_v25  ;;  %v103_v30 = vsel %vm102_vm8, %v207_v5, %v99_v26 }
  0x1f   :  { %v125_v31 = vand.u32 2147483647, %v93_v28  ;;  %v108_v32 = vsel %vm105_vm9, %v107_v23, %v103_v30  ;;  %v118_v33 = vsel %vm117_vm10, %v209_v8, %v114_v29  ;;  %v175_v8 = vstv %s385_s1 }
  0x20   :  { %v123_v34 = vsel %vm120_vm11, %v122_v27, %v118_v33  ;;  %v126_v35 = vand.u32 2147483647, %v108_v32  ;;  %vm176_vm0 = vcmp.lt.s32.totalorder %v174_v6, %v175_v8 }
  0x21   :  { %v127_v36 = vand.u32 2147483647, %v123_v34 }
  0x22   :  { %v128_v37 = vadd.f32 %v126_v35, %v125_v31 }
  0x24   :  { %v129_v38 = vadd.f32 %v128_v37, %v127_v36 }
  0x26   :  { %v130_v39 = vmax.f32 %v129_v38, 1e-12 }
  0x28   :  { %210 = vrcp.f32 %v130_v39  ;;  %v142_v44 = vand.u32 2147483648, %v130_v39  ;;  %vm136_vm12 = vweird.f32 %v130_v39  ;;  %v140_v46 = vand.u32 2147483647, %v130_v39 }
  0x29   :  { %212 = vlog2.f32 %v68_v40 }
  0x2a   :  { %214 = vlog2.f32 %v76_v41  ;;  %v143_v49 = vor.u32 1.1754944e-38, %v142_v44  ;;  %vm141_vm15 = vcmp.eq.f32.partialorder %v140_v46, 8.507059e+37 }
  0x2e   :  { %v211_v42 = vpop.eup %210 }
  0x2f   :  { %v132_v43 = vmul.f32 %v211_v42, %v130_v39  ;;  %vm137_vm13 = vweird.f32 %v211_v42  ;;  %v213_v48 = vpop.eup %212 }
  0x30   :  { %vm138_vm14 = vmor %vm136_vm12, %vm137_vm13  ;;  %v215_v52 = vpop.eup %214  ;;  %v74_v53 = vmul.f32 0.6931472, %v213_v48 }
  0x31   :  { %v133_v45 = vsub.f32 1.0, %v132_v43  ;;  %v78_v58 = vmul.f32 0.6931472, %v215_v52 }
  0x32   :  { %v75_v61 = vmax.f32 %v74_v53, -100.0 }
  0x33   :  { %v134_v47 = vmul.f32 %v211_v42, %v133_v45  ;;  %v79_v2 = vmax.f32 %v78_v58, -100.0 }
  0x35   :  { %v135_v51 = vadd.f32 %v211_v42, %v134_v47 }
  0x37   :  { %v139_v54 = vsel %vm138_vm14, %v211_v42, %v135_v51 }
  0x38   :  { %v144_v55 = vsel %vm141_vm15, %v143_v49, %v139_v54 }
  0x39   :  { %v145_v59 = vmul.f32 %v144_v55, %v93_v28 }
  0x3b   :  { %v147_v62 = vmul.f32 %v146_v56, %v145_v59 }
  0x3d   :  { %v148_v3 = vsub.f32 %v69_v60, %v147_v62 }
  0x3f   :  { %v151_v4 = vsub.f32 %v150_v63, %v148_v3  ;;  %v152_v5 = vmul.f32 %v148_v3, %v75_v61 }
  0x41   :  { %v153_v7 = vmul.f32 %v151_v4, %v79_v2 }
  0x43   :  { %v154_v9 = vadd.f32 %v153_v7, %v152_v5 }
  0x45   :  { %v155_v10 = vsub.f32 0.0, %v154_v9 }
  0x47   :  { %v177_v11 = vsel %vm176_vm0, %v155_v10, 0.0 }
  0x48   :  { %179 = vst [vmem:[#allocation10] sm:$0xff] %v177_v11 }
  0x49   :  { %190 = dma.vmem_to_hbm [thread:$0]  %s186_s14, 128, %s188_s17, [#allocation6]  }
  0x4a   :  { %316 = dma.done.wait [#allocation6], 128  }
  0x4b   :  { %317 = vsyncadd [#allocation6], 4294967168 }
  0x4c   :  { %195 = vsyncpa [#allocation5], 1 }
  0x4d   :  { %196 = vsyncpa [#allocation8], 1 }
  0x4e   :  { %197 = vsyncpa [#allocation6], 1 }

</bundles_post_ra>
